<compile_context>
chip_gen: v5e
topology: v5e:2x2
jax: 0.10.0
libtpu: 0.0.40
codegen_flags: <defaults>
</compile_context>

<pallas_src>
import functools

import jax
import jax.numpy as jnp
from jax import lax
from jax.experimental import pallas as pl
from jax.experimental.pallas import tpu as pltpu

_LANES = 128
_NUM_CORES = 2  # leading "parallel" axis; serial (and cheap) on 1-TC chips


def _l2p_partial_kernel(yh_ref, y_ref, o_ref, *, tile_rows, steps, rows):
    """Accumulates per-lane partial sums of (y - y_hat)^2 into an (8,128) block."""
    c = pl.program_id(0)  # core ("parallel") axis
    s = pl.program_id(1)  # reduction ("arbitrary") axis

    @pl.when(s == 0)
    def _():
        o_ref[...] = jnp.zeros_like(o_ref)

    d = y_ref[...].astype(jnp.float32) - yh_ref[...].astype(jnp.float32)
    sq = d * d  # (tile_rows, 128) f32

    # Mask rows outside [0, rows): covers the partial last tile (garbage pad
    # rows) and overflow steps whose block index was clamped in the index_map.
    tile_idx = c * steps + s  # UNclamped logical tile index
    row_start = tile_idx * tile_rows
    row_ids = row_start + lax.broadcasted_iota(jnp.int32, (tile_rows, _LANES), 0)
    sq = jnp.where(row_ids < rows, sq, 0.0)

    # Fold sublane groups into the fixed (8,128) accumulator: pure VALU adds
    # on vreg-aligned slabs, fully hidden under the DMA-bound loop.
    o_ref[...] += sq.reshape(tile_rows // 8, 8, _LANES).sum(axis=0)


def _default_tile_rows(itemsize):
    """Generation-aware target bytes per input per grid step."""
    try:
        kind = jax.devices()[0].device_kind.lower()
    except Exception:  # pragma: no cover - defensive
        kind = ""
    if "v7" in kind or "7x" in kind:
        target_bytes = 4 * 1024 * 1024  # 3.2 TB/s HBM; 2 in x 2 buf = 16 MiB < 32 MiB
    elif "v6" in kind:
        target_bytes = 2 * 1024 * 1024  # 8 MiB total double-buffered
    else:
        target_bytes = 1 * 1024 * 1024  # v5e-safe: 4 MiB total < 16 MiB scoped VMEM
    return target_bytes // (_LANES * itemsize)


def l2p_loss(y_hat, y, p=1.0, *, tile_rows=None):
    """Pallas implementation of L2p_Loss.forward(y_hat, y)."""
    assert y_hat.shape == y.shape, (y_hat.shape, y.shape)
    total = int(y.size)

    yh2d = jnp.ravel(y_hat)  # native dtype; cast happens inside the kernel
    y2d = jnp.ravel(y)

    # Lane-align only if needed (<=127 extra elements; zero-pads on BOTH inputs
    # give zero diffs). The common NN-tensor case (total % 128 == 0) incurs no
    # extra HBM pass at all.
    if total % _LANES != 0:
        pad = _LANES - total % _LANES
        yh2d = jnp.pad(yh2d, (0, pad))
        y2d = jnp.pad(y2d, (0, pad))
    rows = yh2d.size // _LANES
    yh2d = yh2d.reshape(rows, _LANES)
    y2d = y2d.reshape(rows, _LANES)

    # Tiny inputs: guarantee at least one full (16,128) tile (cheap, tiny pad).
    if rows < 16:
        yh2d = jnp.pad(yh2d, ((0, 16 - rows), (0, 0)))
        y2d = jnp.pad(y2d, ((0, 16 - rows), (0, 0)))
        rows = 16

    itemsize = max(jnp.dtype(y.dtype).itemsize, jnp.dtype(y_hat.dtype).itemsize)
    if tile_rows is None:
        tile_rows = _default_tile_rows(itemsize)
    # Multiple of 16 (covers bf16 (16,128) packing and f32 (8,128)); never
    # larger than the array itself.
    tile_rows = max(16, (int(tile_rows) // 16) * 16)
    tile_rows = min(tile_rows, (rows // 16) * 16)

    num_tiles = pl.cdiv(rows, tile_rows)
    steps = pl.cdiv(num_tiles, _NUM_CORES)
    grid = (_NUM_CORES, steps)

    def in_index_map(c, s):
        # Clamp so overflow steps (from the even per-core split) re-read the
        # last valid tile; their contribution is fully masked in-kernel.
        t = jnp.minimum(c * steps + s, num_tiles - 1)
        return (t, 0)

    partials = pl.pallas_call(
        functools.partial(
            _l2p_partial_kernel, tile_rows=tile_rows, steps=steps, rows=rows
        ),
        out_shape=jax.ShapeDtypeStruct((_NUM_CORES * 8, _LANES), jnp.float32),
        grid_spec=pltpu.PrefetchScalarGridSpec(
            num_scalar_prefetch=0,
            grid=grid,
            in_specs=[
                pl.BlockSpec((tile_rows, _LANES), in_index_map),
                pl.BlockSpec((tile_rows, _LANES), in_index_map),
            ],
            out_specs=pl.BlockSpec((8, _LANES), lambda c, s: (c, 0)),
        ),
        compiler_params=pltpu.CompilerParams(
            dimension_semantics=("parallel", "arbitrary"),
        ),
    )(yh2d, y2d)

    # Tiny finalize on the (2*8, 128) partials in plain JAX (also combines the
    # two per-core accumulators).
    sq_sum = jnp.sum(partials)
    if p == 2.0:
        return sq_sum
    if p == 1.0:
        return jnp.sqrt(sq_sum)
    return jnp.power(jnp.sqrt(sq_sum), jnp.float32(p))


def _ref(y_hat, y, p):
    return jnp.power(jnp.sqrt(jnp.sum((y.astype(jnp.float32) - y_hat.astype(jnp.float32)) ** 2)),
                     jnp.float32(p))


if __name__ == "__main__":
    key = jax.random.PRNGKey(0)
    k1, k2, k3, k4, k5, k6 = jax.random.split(key, 6)

    # NCHW inputs, as the PyTorch module would receive.
    y_hat = jax.random.normal(k1, (2, 4, 16, 16), dtype=jnp.float32)
    y = jax.random.normal(k2, (2, 4, 16, 16), dtype=jnp.float32)
    p = 1.0
    loss = jax.block_until_ready(l2p_loss(y_hat, y, p=p))
    ref = _ref(y_hat, y, p)
    assert jnp.allclose(loss, ref, rtol=1e-5, atol=1e-5), (loss, ref)

    # Non-lane-aligned shape (exercises the minimal pad path) + p != 1.
    y_hat2 = jax.random.normal(k3, (2, 3, 17, 19), dtype=jnp.float32)
    y2 = jax.random.normal(k4, (2, 3, 17, 19), dtype=jnp.float32)
    loss2 = jax.block_until_ready(l2p_loss(y_hat2, y2, p=2.0))
    ref2 = _ref(y_hat2, y2, 2.0)
    assert jnp.allclose(loss2, ref2, rtol=1e-5, atol=1e-5), (loss2, ref2)

    # Ragged row count with explicit small tiles (exercises in-kernel masking,
    # the clamped overflow step on core 1, and bf16 in-kernel casting).
    y_hat3 = jax.random.normal(k5, (1, 1, 40, 128), dtype=jnp.bfloat16)
    y3 = jax.random.normal(k6, (1, 1, 40, 128), dtype=jnp.bfloat16)
    loss3 = jax.block_until_ready(l2p_loss(y_hat3, y3, p=3.0, tile_rows=16))
    ref3 = jnp.power(jnp.sqrt(jnp.sum(
        (y3.astype(jnp.float32) - y_hat3.astype(jnp.float32)) ** 2)), jnp.float32(3.0))
    assert jnp.allclose(loss3, ref3, rtol=1e-4, atol=1e-4), (loss3, ref3)

    print("KERNEL_OK")
</pallas_src>

<mosaic_0001>
module attributes {stable_mosaic.version = 11 : i64} {
  func.func @_l2p_partial_kernel(%arg0: i32, %arg1: i32, %arg2: memref<16x128xf32, #tpu.memory_space<vmem>>, %arg3: memref<16x128xf32, #tpu.memory_space<vmem>>, %arg4: memref<8x128xf32, #tpu.memory_space<vmem>>) attributes {dimension_semantics = [#tpu.dimension_semantics<parallel>, #tpu.dimension_semantics<arbitrary>], iteration_bounds = array<i64: 2, 1>, scalar_prefetch = 0 : i64, scratch_operands = 0 : i64, tpu.core_type = #tpu.core_type<tc>, window_params = [{transform_indices = @transform_0, window_bounds = array<i64: 16, 128>}, {transform_indices = @transform_1, window_bounds = array<i64: 16, 128>}, {transform_indices = @transform_2, window_bounds = array<i64: 8, 128>}]} {
    %c0_i32 = arith.constant 0 : i32
    %0 = arith.cmpi eq, %arg1, %c0_i32 : i32
    %1 = arith.extui %0 : i1 to i32
    %c0_i32_0 = arith.constant 0 : i32
    %2 = arith.cmpi ne, %1, %c0_i32_0 : i32
    scf.if %2 {
      %cst_10 = arith.constant 0.000000e+00 : f32
      %22 = vector.broadcast %cst_10 : f32 to vector<8x128xf32>
      %c0_11 = arith.constant 0 : index
      %c0_12 = arith.constant 0 : index
      %23 = vector.load %arg4[%c0_11, %c0_12] : memref<8x128xf32, #tpu.memory_space<vmem>>, vector<8x128xf32>
      tpu.vector_store %arg4[%c0_11, %c0_12], %22 {strides = array<i32>} : memref<8x128xf32, #tpu.memory_space<vmem>>, vector<8x128xf32>,
    } else {
    }
    %c0 = arith.constant 0 : index
    %c0_1 = arith.constant 0 : index
    %3 = vector.load %arg3[%c0, %c0_1] : memref<16x128xf32, #tpu.memory_space<vmem>>, vector<16x128xf32>
    %c0_2 = arith.constant 0 : index
    %c0_3 = arith.constant 0 : index
    %4 = vector.load %arg2[%c0_2, %c0_3] : memref<16x128xf32, #tpu.memory_space<vmem>>, vector<16x128xf32>
    %5 = arith.subf %3, %4 : vector<16x128xf32>
    %6 = arith.mulf %5, %5 : vector<16x128xf32>
    %c1_i32 = arith.constant 1 : i32
    %7 = arith.muli %arg0, %c1_i32 : i32
    %8 = arith.addi %7, %arg1 : i32
    %c16_i32 = arith.constant 16 : i32
    %9 = arith.muli %8, %c16_i32 : i32
    %10 = tpu.iota {dimensions = array<i32: 0>} : vector<16x128xi32>
    %11 = vector.broadcast %9 : i32 to vector<16x128xi32>
    %12 = arith.addi %11, %10 : vector<16x128xi32>
    %c16_i32_4 = arith.constant 16 : i32
    %13 = vector.broadcast %c16_i32_4 : i32 to vector<16x128xi32>
    %14 = arith.cmpi slt, %12, %13 : vector<16x128xi32>
    %cst = arith.constant 0.000000e+00 : f32
    %15 = vector.broadcast %cst : f32 to vector<16x128xf32>
    %16 = arith.select %14, %6, %15 : vector<16x128xi1>, vector<16x128xf32>
    %c0_5 = arith.constant 0 : index
    %c0_6 = arith.constant 0 : index
    %17 = vector.load %arg4[%c0_5, %c0_6] : memref<8x128xf32, #tpu.memory_space<vmem>>, vector<8x128xf32>
    %18 = vector.shape_cast %16 : vector<16x128xf32> to vector<2x8x128xf32>
    %cst_7 = arith.constant dense<0.000000e+00> : vector<8x128xf32>
    %19 = vector.multi_reduction <add>, %18, %cst_7 [0] : vector<2x8x128xf32> to vector<8x128xf32>
    %20 = arith.addf %17, %19 : vector<8x128xf32>
    %c0_8 = arith.constant 0 : index
    %c0_9 = arith.constant 0 : index
    %21 = vector.load %arg4[%c0_8, %c0_9] : memref<8x128xf32, #tpu.memory_space<vmem>>, vector<8x128xf32>
    tpu.vector_store %arg4[%c0_8, %c0_9], %20 {strides = array<i32>} : memref<8x128xf32, #tpu.memory_space<vmem>>, vector<8x128xf32>,
    return
  }
  func.func @transform_0(%arg0: i32, %arg1: i32) -> (i32, i32) {
    %c1_i32 = arith.constant 1 : i32
    %0 = arith.muli %arg0, %c1_i32 : i32
    %1 = arith.addi %0, %arg1 : i32
    %c0_i32 = arith.constant 0 : i32
    %2 = arith.minsi %1, %c0_i32 : i32
    %c0_i32_0 = arith.constant 0 : i32
    %c0_i32_1 = arith.constant 0 : i32
    return %2, %c0_i32_0 : i32, i32
  }
  func.func @transform_1(%arg0: i32, %arg1: i32) -> (i32, i32) {
    %c1_i32 = arith.constant 1 : i32
    %0 = arith.muli %arg0, %c1_i32 : i32
    %1 = arith.addi %0, %arg1 : i32
    %c0_i32 = arith.constant 0 : i32
    %2 = arith.minsi %1, %c0_i32 : i32
    %c0_i32_0 = arith.constant 0 : i32
    %c0_i32_1 = arith.constant 0 : i32
    return %2, %c0_i32_0 : i32, i32
  }
  func.func @transform_2(%arg0: i32, %arg1: i32) -> (i32, i32) {
    %c0_i32 = arith.constant 0 : i32
    %c0_i32_0 = arith.constant 0 : i32
    return %arg0, %c0_i32 : i32, i32
  }
}

</mosaic_0001>

<bundles_post_ra>
// kernel: tpu_custom_call.1
= control target key start
LH: loop header
LB: loop body
LE: loop exit
PB: predicated region body
PF: predicated region fallthrough
CT: control target
= control target key end

     0   :  { %7 = vsyncpa [#allocation3], 0  ;;  %s862_s0 = inlined_call_operand.hbm [shape: f32[16,128], index: 0, kind: input, shape index: {}]   ;;  %s863_s1 = inlined_call_operand.hbm [shape: f32[16,128], index: 1, kind: input, shape index: {}]   ;;  %s864_s2 = inlined_call_operand.hbm [shape: f32[16,128], index: 2, kind: output, shape index: {}]  }
   0x1   :  { %9 = vsyncpa [#allocation3 + $0x1], 0 }
   0x2   :  { %10 = vsyncpa [#allocation6], 0 }
   0x3   :  { %12 = vsyncpa [#allocation6 + $0x1], 0 }
   0x4   :  { %13 = vsyncpa [#allocation4], 0 }
   0x5   :  { %15 = vsyncpa [#allocation4 + $0x1], 0  ;;  %s693_s9 = smov 0   ;;  %s695_s10 = smov 0  }
   0x6   :  { %s697_s11 = smov 0   ;;  %s699_s12 = smov 0  }
   0x7   :  { %s701_s13 = smov 0   ;;  %s703_s14 = smov 0  }
   0x8   :  { %s705_s15 = smov 0   ;;  %s707_s16 = smov 0  }
   0x9 LB: > { %s390_s17 = sadd.s32 4294967295, %s672_s16   ;;  %s391_s18 = sadd.s32 4294967294, %s672_s16   ;;  %s672_s16 = sphi %s707_s16, %s21_s16   ;;  %s668_s15 = sphi %s705_s15, %s876_s15   ;;  %s664_s14 = sphi %s703_s14, %s875_s14   ;;  %s660_s13 = sphi %s701_s13, %s852_s13   ;;  %s656_s12 = sphi %s699_s12, %s874_s12   ;;  %s652_s11 = sphi %s697_s11, %s873_s11   ;;  %s648_s10 = sphi %s695_s10, %s872_s10   ;;  %s644_s9 = sphi %s693_s9, %s871_s9  }
   0xa   : > { %s33_s19 = sadd.s32 1, %s668_s15  ;;  %p641_p1 = scmp.ne.s32.totalorder %s660_s13, 0 }
   0xb   : > { %p35_p0 = scmp.ge.s32.totalorder %s33_s19, 2  ;;  %p54_p2 = scmp.eq.s32.totalorder %s672_s16, 0 }
   0xc   : > { %p59_p3 = scmp.ne.s32.totalorder %s660_s13, %s656_s12  ;;  %p60_p5 = scmp.eq.s32.totalorder %s390_s17, 0 }
   0xd   : > { %s878_s19 = smov (%p35_p0, %s33_s19), 0  ;;  %p739_p4 = por %p641_p1, %p54_p2 }
   0xe   : > { %p743_p6 = por %p60_p5, %p59_p3  ;;  %s101_s22 = ssub.s32 %s668_s15, %s878_s19 }
   0xf   : > { %p102_p7 = scmp.eq.s32.totalorder %s101_s22, 0  ;;  %s104_s23 = sadd.s32 1, %s652_s11 }
  0x10   : > { %p114_p8 = scmp.ne.s32.totalorder %s652_s11, %s648_s10  ;;  %p115_p9 = scmp.eq.s32.totalorder %s390_s17, 1 }
  0x11   : > { %s751_s24 = scalar_select %p102_p7, %s652_s11, %s104_s23  }
  0x12   : > { %p120_p10 = scmp.ne.s32.totalorder %s648_s10, %s644_s9  ;;  %p121_p11 = scmp.eq.s32.totalorder %s391_s18, 1 }
  0x13   : > { %p757_p12 = por %p115_p9, %p114_p8  ;;  %p393_p13 = scmp.ge.s32.totalorder %s672_s16, 2 }
  0x14   : > { %p762_p0 = por %p121_p11, %p120_p10  ;;  %p428_p1 = scmp.lt.s32.totalorder %s672_s16, 2 }
  0x15   : > { %s154_s29 = sshll.u32 %s862_s0, 4  ;;  %s674_s30 = smov [#allocation2]   ;;  %s155_s29 = int_to_ptr.hbm [resolvable:$true] %s154_s29 }
  0x16   : > { %s156_s3 = sshll.u32 %s674_s30, 4  ;;  %p772_p2 = pnand %p428_p1, %p739_p4  ;;  %s157_s3 = int_to_ptr.vmem [resolvable:$true] %s156_s3 }
  0x17   : > { %p400_p3 = scmp.ge.s32.totalorder %s672_s16, 1  ;;  %p189_p5 = scmp.lt.s32.totalorder %s672_s16, 3 }
  0x18   : > { %s505_s5 = sshra.s32 %s155_s29, 4  ;;  %p509_p8 = pneg %p772_p2  ;;  %s506_s5 = int_to_ptr.hbm [resolvable:$true] %s505_s5 }
  0x19   : > { %s507_s6 = scalar_lea.hbm %s506_s5, 16  ;;  %s512_s12 = scalar_lea.hbm %s862_s0, 16 }
  0x1a   : > { %p508_p7 = scmp.ne.s32.totalorder %s506_s5, %s507_s6  ;;  %p514_p4 = scmp.lt.s32.totalorder %s512_s12, %s507_s6 }
  0x1c   : > { %p510_p9 = pnand %p509_p8, %p508_p7 }
  0x1e   : > { %p511_p10 = pneg %p510_p9 }
  0x20   : > { %p516_p11 = pnand %p514_p4, %p511_p10 }
  0x22   : > { %519 = shalt.err (!%p516_p11)
}
  0x23   : > { %s675_s17 = smov 128   ;;  %s676_s18 = smov 8  }
  0x24   : > { %420 = dma.hbm_to_vmem [thread:$0]  (!%p772_p2), %s155_s29, 256, %s157_s3, [#allocation3], %s675_s17, %s675_s17, %s676_s18  }
  0x25   : > { %p792_p1 = pnand %p400_p3, %p189_p5  ;;  %s179_s27 = sshll.u32 %s863_s1, 4  ;;  %s180_s27 = int_to_ptr.hbm [resolvable:$true] %s179_s27 }
  0x26   : > { %s677_s28 = smov [#allocation5]   ;;  %s535_s5 = sshra.s32 %s180_s27, 4  ;;  %s536_s5 = int_to_ptr.hbm [resolvable:$true] %s535_s5 }
  0x27   : > { %s181_s30 = sshll.u32 %s677_s28, 4  ;;  %s537_s6 = scalar_lea.hbm %s536_s5, 16  ;;  %s182_s30 = int_to_ptr.vmem [resolvable:$true] %s181_s30 }
  0x28   : > { %p538_p7 = scmp.ne.s32.totalorder %s536_s5, %s537_s6  ;;  %s542_s7 = scalar_lea.hbm %s863_s1, 16 }
  0x29   : > { %p544_p3 = scmp.lt.s32.totalorder %s542_s7, %s537_s6 }
  0x2a   : > { %p540_p9 = pnand %p538_p7, %p509_p8 }
  0x2c   : > { %p541_p10 = pneg %p540_p9 }
  0x2e   : > { %p546_p5 = pnand %p544_p3, %p541_p10 }
  0x30   : > { %549 = shalt.err (!%p546_p5)
}
  0x31   : > { %423 = dma.hbm_to_vmem [thread:$0]  (!%p772_p2), %s180_s27, 256, %s182_s30, [#allocation6], %s675_s17, %s675_s17, %s676_s18  }
  0x32   : > { %193 = sbr.rel (%p792_p1) target bundleno = 74 (0x4a), region = 28  ;;  %s195_s8 = sand.u32 (!%p792_p1), 1, %s660_s13  }
  0x33   : > { %s401_s12 = sshll.u32 (!%p792_p1), %s195_s8, 4  ;;  %s196_s22 = scalar_lea.sflag (!%p792_p1), [#allocation3], %s195_s8 }
  0x34   : > { %s199_s23 = scalar_lea.vmem (!%p792_p1), [#allocation2], %s401_s12 }
  0x37   : > { %630 = dma.done.wait (%p743_p6), %s196_s22, 256  }
  0x38   : > { %632 = vsyncadd (%p743_p6), %s196_s22, 4294967040  ;;  %s206_s28 = scalar_lea.sflag [#allocation6], %s195_s8  ;;  %s209_s5 = scalar_lea.vmem [#allocation5], %s401_s12 }
  0x39   : > { %634 = dma.done.wait (%p743_p6), %s206_s28, 256  }
  0x3a   : > { %636 = vsyncadd (%p743_p6), %s206_s28, 4294967040  ;;  %s404_s4 = sshll.u32 %s664_s14, 4  ;;  %v259_v0 = vlaneseq  ;;  %s233_s17 = sand.u32 1, %s648_s10   ;;  %v249_v6 = vld [vmem:[%s209_s5] sm:$0xff]  ;;  %v250_v7 = vld [vmem:[%s209_s5 + $0x8] sm:$0xff] }
  0x3b   : > { %v262_v2 = vstv %s404_s4  ;;  %s403_s18 = sshll.u32 %s233_s17, 3  ;;  %v251_v8 = vld [vmem:[%s199_s23] sm:$0xff]  ;;  %s406_s20 = sshll.u32 %s664_s14, 3  ;;  %v252_v9 = vld [vmem:[%s199_s23 + $0x8] sm:$0xff] }
  0x3c   : > { %v260_v1 = vshrl.u32 %v259_v0, 7  ;;  %v253_v10 = vsub.f32 %v249_v6, %v251_v8  ;;  %v254_v11 = vsub.f32 %v250_v7, %v252_v9  ;;  %s284_s30 = scalar_lea.hbm %s864_s2, %s406_s20  ;;  %s235_s6 = scalar_lea.vmem [#allocation7], %s403_s18 }
  0x3d   : > { %s286_s29 = sshll.u32 %s235_s6, 4  ;;  %s288_s3 = sshll.u32 %s284_s30, 4  ;;  %s287_s29 = int_to_ptr.vmem [resolvable:$true] %s286_s29  ;;  %s289_s3 = int_to_ptr.hbm [resolvable:$true] %s288_s3 }
  0x3e   : > { %v261_v3 = vadd.s32 8, %v260_v1  ;;  %v263_v4 = vadd.s32 %v262_v2, %v260_v1  ;;  %v255_v12 = vmul.f32 %v253_v10, %v253_v10  ;;  %v256_v13 = vmul.f32 %v254_v11, %v254_v11  ;;  %s274_s14 = scalar_lea.sflag [#allocation4], %s233_s17  ;;  %s579_s7 = sshra.s32 %s289_s3, 4  ;;  %s580_s7 = int_to_ptr.hbm [resolvable:$true] %s579_s7 }
  0x3f   : > { %s581_s8 = scalar_lea.hbm %s580_s7, 8  ;;  %s585_s23 = scalar_lea.hbm %s864_s2, 16 }
  0x40   : > { %v264_v5 = vadd.s32 %v262_v2, %v261_v3  ;;  %vm265_vm0 = vcmp.lt.s32.totalorder %v263_v4, 16  ;;  %p582_p6 = scmp.ne.s32.totalorder %s580_s7, %s581_s8  ;;  %p586_p4 = scmp.lt.s32.totalorder %s580_s7, %s864_s2 }
  0x41   : > { %v267_v14 = vsel %vm265_vm0, %v255_v12, 0.0  ;;  %p587_p11 = scmp.lt.s32.totalorder %s585_s23, %s581_s8 }
  0x42   : > { %vm266_vm1 = vcmp.lt.s32.totalorder %v264_v5, 16  ;;  %p583_p2 = pnand %p582_p6, %p757_p12 }
  0x43   : > { %v268_v15 = vsel %vm266_vm1, %v256_v13, 0.0  ;;  %p588_p1 = por %p587_p11, %p586_p4 }
  0x44   : > { %v270_v16 = vadd.f32 %v268_v15, %v267_v14  ;;  %p584_p8 = pneg %p583_p2 }
  0x46   : > { %272 = vst [vmem:[%s235_s6] sm:$0xff] %v270_v16  ;;  %p589_p7 = pnand %p588_p1, %p584_p8 }
  0x48   : > { %592 = shalt.err (!%p589_p7)
}
  0x49   : > { %415 = dma.vmem_to_hbm [thread:$0]  (%p757_p12), %s287_s29, 128, %s289_s3, %s274_s14  }
  0x4a PF: > { %s300_s4 = sand.u32 1, %s644_s9   ;;  %p425_p9 = pnand %p393_p13, %p762_p0 }
  0x4b   : > { %s301_s17 = scalar_lea.sflag [#allocation4], %s300_s4 }
  0x4c   : > { %p426_p10 = pneg %p425_p9 }
  0x4e   : > { %638 = dma.done.wait (%p426_p10), %s301_s17, 128  }
  0x4f   : > { %640 = vsyncadd (%p426_p10), %s301_s17, 4294967168  ;;  %s21_s16 = sadd.s32 1, %s672_s16   ;;  %s871_s9 = smov %s648_s10 }
  0x50   : > { %p18_p3 = scmp.ge.s32.totalorder %s21_s16, 4   ;;  %s872_s10 = smov %s652_s11 }
  0x51   : > { %s873_s11 = smov %s751_s24  ;;  %s874_s12 = smov %s660_s13 }
  0x52   : > { %s852_s13 = smov 0   ;;  %s875_s14 = smov %s668_s15 }
  0x53   : > { %s876_s15 = smov %s878_s19  ;;  %20 = sbr.rel (!%p18_p3) target bundleno = 9 (0x9), region = 90 }
  0x58   :  { %307 = vsyncpa [#allocation3], 1 }
  0x59   :  { %309 = vsyncpa [#allocation3 + $0x1], 1 }
  0x5a   :  { %310 = vsyncpa [#allocation6], 1 }
  0x5b   :  { %312 = vsyncpa [#allocation6 + $0x1], 1 }
  0x5c   :  { %313 = vsyncpa [#allocation4], 1 }
  0x5d   :  { %315 = vsyncpa [#allocation4 + $0x1], 1 }

</bundles_post_ra>
